<compile_context>
chip_gen: v5e
topology: v5e:2x2
jax: 0.10.0
libtpu: 0.0.40
codegen_flags: <defaults>
</compile_context>

<pallas_src>
import functools

import jax
import jax.numpy as jnp
from jax.experimental import pallas as pl
from jax.experimental.pallas import tpu as pltpu

EPS = 1e-5          # nn.BatchNorm1d default eps
OUT_LANES = 128     # lane-dense combined output slab width
N_PAD = 32          # width of `padroes`
ANOM_COLS = OUT_LANES - N_PAD   # 96; anomalia sits in column 0 of this span
TILE_TARGET = 2048  # default batch-tile target (review: 1024-2048 sweet spot)


def _round_up(n, m):
    return ((n + m - 1) // m) * m


# --------------------------------------------------------------------------
# Kernel
# --------------------------------------------------------------------------
def _mlp_kernel(x_ref,
                w1, b1, w2, b2, w3, b3, w4, b4, w5, b5, wa, ba,
                out_ref):
    x = x_ref[...].astype(jnp.float32)

    def lin(h, w_r, b_r):
        return jnp.dot(h, w_r[...],
                       preferred_element_type=jnp.float32,
                       precision=jax.lax.Precision.HIGHEST) + b_r[...]

    # BN(eval) + Dropout(identity) are pre-folded into w2/b2, w3/b3, w4/b4.
    h = jnp.maximum(lin(x, w1, b1), 0.0)      # Linear(in,128) + ReLU
    h = jnp.maximum(lin(h, w2, b2), 0.0)      # (BN1 folded) Linear(128,64) + ReLU
    h = jnp.maximum(lin(h, w3, b3), 0.0)      # (BN2 folded) Linear(64,32)  + ReLU
    h = jnp.maximum(lin(h, w4, b4), 0.0)      # (BN3 folded) Linear(32,64)  + ReLU
    features = lin(h, w5, b5)                 # Linear(64,32)
    padroes = jnp.maximum(features, 0.0)      # network[-2] ReLU

    # Lane-dense (tile_b, 128) slab: cols 0:32 = padroes (direct store, exact),
    # cols 32:128 = [anomalia, zeros] via a small padded projection.
    out_ref[:, :N_PAD] = padroes.astype(out_ref.dtype)
    out_ref[:, N_PAD:] = lin(padroes, wa, ba).astype(out_ref.dtype)


# --------------------------------------------------------------------------
# Parameter folding (run ONCE, outside the hot path)
# --------------------------------------------------------------------------
def fold_params(params):
    """Fold eval-mode BN into the following Linear; pad the anomalia head."""
    (w1, b1, g1, be1, m1, v1,
     w2, b2, g2, be2, m2, v2,
     w3, b3, g3, be3, m3, v3,
     w4, b4, w5, b5, w6, b6) = params

    def fold(g, be, m, v, w_next, b_next):
        s = g * jax.lax.rsqrt(v + EPS)              # (1, n)
        t = be - m * s                              # (1, n)
        w_f = s.reshape(-1, 1) * w_next             # (n, out)
        b_f = t @ w_next + b_next                   # (1, out)
        return w_f.astype(jnp.float32), b_f.astype(jnp.float32)

    w2f, b2f = fold(g1, be1, m1, v1, w2, b2)
    w3f, b3f = fold(g2, be2, m2, v2, w3, b3)
    w4f, b4f = fold(g3, be3, m3, v3, w4, b4)

    # anomalia head Linear(32,1) padded to 96 output cols (col 0 = anomalia).
    wa = jnp.zeros((N_PAD, ANOM_COLS), jnp.float32).at[:, 0:1].set(
        w6.astype(jnp.float32))
    ba = jnp.zeros((1, ANOM_COLS), jnp.float32).at[:, 0:1].set(
        b6.astype(jnp.float32))

    return (w1.astype(jnp.float32), b1.astype(jnp.float32),
            w2f, b2f, w3f, b3f, w4f, b4f,
            w5.astype(jnp.float32), b5.astype(jnp.float32), wa, ba)


# --------------------------------------------------------------------------
# Forward wrapper (jit this; pass pre-folded params)
# --------------------------------------------------------------------------
def rede_neural_forward(x, folded, *, max_tile_b=TILE_TARGET,
                        out_dtype=jnp.float32):
    """x: (B, input_size) float32, folded = fold_params(params).

    Returns (anomalia (B,1), padroes (B,32)).
    """
    B, F = x.shape

    # Adaptive tile: big for throughput, padding waste bounded to <8 rows,
    # and >=2 grid steps when B >= 16 so v7x's two TensorCores both get work.
    b8 = _round_up(max(B, 1), 8)
    n_steps = max(1, pl.cdiv(b8, int(max_tile_b)))
    if b8 >= 16:
        n_steps = max(n_steps, 2)
    tile_b = _round_up(pl.cdiv(b8, n_steps), 8)
    b_pad = tile_b * pl.cdiv(b8, tile_b)
    if b_pad != B:
        x = jnp.pad(x, ((0, b_pad - B), (0, 0)))
    grid = (b_pad // tile_b,)

    param_specs = [pl.BlockSpec(p.shape, lambda i: (0, 0)) for p in folded]

    out_itemsize = jnp.dtype(out_dtype).itemsize
    flops = 2 * b_pad * (F * 128 + 128 * 64 + 64 * 32 + 32 * 64
                         + 64 * 32 + 32 * ANOM_COLS)
    bytes_accessed = (4 * b_pad * F + out_itemsize * b_pad * OUT_LANES
                      + sum(4 * int(p.size) for p in folded))

    slab = pl.pallas_call(
        _mlp_kernel,
        out_shape=jax.ShapeDtypeStruct((b_pad, OUT_LANES), out_dtype),
        grid=grid,
        in_specs=[pl.BlockSpec((tile_b, F), lambda i: (i, 0))] + param_specs,
        out_specs=pl.BlockSpec((tile_b, OUT_LANES), lambda i: (i, 0)),
        compiler_params=pltpu.CompilerParams(
            dimension_semantics=("parallel",)),
        cost_estimate=pl.CostEstimate(flops=flops, transcendentals=0,
                                      bytes_accessed=bytes_accessed),
    )(x, *folded)

    padroes = slab[:B, :N_PAD]
    anomalia = slab[:B, N_PAD:N_PAD + 1]
    return anomalia, padroes


# --------------------------------------------------------------------------
# Synthetic parameters + pure-JAX reference (for self-check)
# --------------------------------------------------------------------------
def init_params(key, input_size, hidden_sizes=(128, 64, 32)):
    """Deterministic synthetic parameters, torch-Linear-style uniform init.

    Linear weights are (in, out); biases / BN params are (1, out).
    BN running stats / affine are non-trivial so folding is actually tested.
    """
    dims = [input_size] + list(hidden_sizes) + [64, 32, 1]
    keys = jax.random.split(key, 2 * (len(dims) - 1) + 4 * len(hidden_sizes))
    linears = []
    for li in range(len(dims) - 1):
        fan_in, fan_out = dims[li], dims[li + 1]
        bound = 1.0 / jnp.sqrt(fan_in)
        w = jax.random.uniform(keys[2 * li], (fan_in, fan_out),
                               jnp.float32, -bound, bound)
        b = jax.random.uniform(keys[2 * li + 1], (1, fan_out),
                               jnp.float32, -bound, bound)
        linears.append((w, b))

    bn_keys = keys[2 * (len(dims) - 1):]

    def bn_params(n, idx):
        k0, k1, k2, k3 = bn_keys[4 * idx: 4 * idx + 4]
        g = jax.random.uniform(k0, (1, n), jnp.float32, 0.5, 1.5)
        be = 0.1 * jax.random.normal(k1, (1, n), jnp.float32)
        m = 0.1 * jax.random.normal(k2, (1, n), jnp.float32)
        v = jax.random.uniform(k3, (1, n), jnp.float32, 0.5, 1.5)
        return g, be, m, v

    (w1, b1), (w2, b2), (w3, b3), (w4, b4), (w5, b5), (w6, b6) = linears
    g1, be1, m1, v1 = bn_params(hidden_sizes[0], 0)
    g2, be2, m2, v2 = bn_params(hidden_sizes[1], 1)
    g3, be3, m3, v3 = bn_params(hidden_sizes[2], 2)

    return (w1, b1, g1, be1, m1, v1,
            w2, b2, g2, be2, m2, v2,
            w3, b3, g3, be3, m3, v3,
            w4, b4, w5, b5, w6, b6)


def _reference_forward(x, params):
    """Pure-JAX reference of the same forward pass (unfolded BN)."""
    (w1, b1, g1, be1, m1, v1,
     w2, b2, g2, be2, m2, v2,
     w3, b3, g3, be3, m3, v3,
     w4, b4, w5, b5, w6, b6) = params

    def lin(h, w, b):
        return h @ w + b

    def bn(h, g, be, m, v):
        return (h - m) / jnp.sqrt(v + EPS) * g + be

    h = bn(jnp.maximum(lin(x, w1, b1), 0.0), g1, be1, m1, v1)
    h = bn(jnp.maximum(lin(h, w2, b2), 0.0), g2, be2, m2, v2)
    h = bn(jnp.maximum(lin(h, w3, b3), 0.0), g3, be3, m3, v3)
    h = jnp.maximum(lin(h, w4, b4), 0.0)
    features = lin(h, w5, b5)
    padroes = jnp.maximum(features, 0.0)
    anomalia = lin(padroes, w6, b6)
    return anomalia, padroes


if __name__ == "__main__":
    # Make the pure-JAX reference use full f32 matmul precision so it is
    # directly comparable with the (HIGHEST-precision) kernel dots.
    jax.config.update("jax_default_matmul_precision", "highest")

    key = jax.random.PRNGKey(0)
    k_param, k_x = jax.random.split(key)

    input_size = 16
    batch = 13   # not a multiple of 8 -> exercises padding + 2-step grid path

    params = init_params(k_param, input_size)
    x = jax.random.normal(k_x, (batch, input_size), jnp.float32)

    # Fold once (outside the hot path), jit the forward on the folded params.
    folded = fold_params(params)
    fwd = jax.jit(rede_neural_forward,
                  static_argnames=("max_tile_b", "out_dtype"))

    anomalia, padroes = fwd(x, folded)
    jax.block_until_ready((anomalia, padroes))

    ref_anom, ref_pad = _reference_forward(x, params)
    assert anomalia.shape == (batch, 1) and padroes.shape == (batch, 32)
    assert jnp.allclose(anomalia, ref_anom, atol=1e-4, rtol=1e-4)
    assert jnp.allclose(padroes, ref_pad, atol=1e-4, rtol=1e-4)

    print("KERNEL_OK")
</pallas_src>

<mosaic_0001>
module attributes {stable_mosaic.version = 11 : i64} {
  func.func @_mlp_kernel(%arg0: i32, %arg1: memref<8x16xf32, #tpu.memory_space<vmem>>, %arg2: memref<16x128xf32, #tpu.memory_space<vmem>>, %arg3: memref<1x128xf32, #tpu.memory_space<vmem>>, %arg4: memref<128x64xf32, #tpu.memory_space<vmem>>, %arg5: memref<1x64xf32, #tpu.memory_space<vmem>>, %arg6: memref<64x32xf32, #tpu.memory_space<vmem>>, %arg7: memref<1x32xf32, #tpu.memory_space<vmem>>, %arg8: memref<32x64xf32, #tpu.memory_space<vmem>>, %arg9: memref<1x64xf32, #tpu.memory_space<vmem>>, %arg10: memref<64x32xf32, #tpu.memory_space<vmem>>, %arg11: memref<1x32xf32, #tpu.memory_space<vmem>>, %arg12: memref<32x96xf32, #tpu.memory_space<vmem>>, %arg13: memref<1x96xf32, #tpu.memory_space<vmem>>, %arg14: memref<8x128xf32, #tpu.memory_space<vmem>>) attributes {dimension_semantics = [#tpu.dimension_semantics<parallel>], iteration_bounds = array<i64: 2>, scalar_prefetch = 0 : i64, scratch_operands = 0 : i64, tpu.core_type = #tpu.core_type<tc>, window_params = [{transform_indices = @transform_0, window_bounds = array<i64: 8, 16>}, {pipeline_mode = #tpu.pipeline_mode<synchronous>, transform_indices = @transform_1, window_bounds = array<i64: 16, 128>}, {pipeline_mode = #tpu.pipeline_mode<synchronous>, transform_indices = @transform_2, window_bounds = array<i64: 1, 128>}, {pipeline_mode = #tpu.pipeline_mode<synchronous>, transform_indices = @transform_3, window_bounds = array<i64: 128, 64>}, {pipeline_mode = #tpu.pipeline_mode<synchronous>, transform_indices = @transform_4, window_bounds = array<i64: 1, 64>}, {pipeline_mode = #tpu.pipeline_mode<synchronous>, transform_indices = @transform_5, window_bounds = array<i64: 64, 32>}, {pipeline_mode = #tpu.pipeline_mode<synchronous>, transform_indices = @transform_6, window_bounds = array<i64: 1, 32>}, {pipeline_mode = #tpu.pipeline_mode<synchronous>, transform_indices = @transform_7, window_bounds = array<i64: 32, 64>}, {pipeline_mode = #tpu.pipeline_mode<synchronous>, transform_indices = @transform_8, window_bounds = array<i64: 1, 64>}, {pipeline_mode = #tpu.pipeline_mode<synchronous>, transform_indices = @transform_9, window_bounds = array<i64: 64, 32>}, {pipeline_mode = #tpu.pipeline_mode<synchronous>, transform_indices = @transform_10, window_bounds = array<i64: 1, 32>}, {pipeline_mode = #tpu.pipeline_mode<synchronous>, transform_indices = @transform_11, window_bounds = array<i64: 32, 96>}, {pipeline_mode = #tpu.pipeline_mode<synchronous>, transform_indices = @transform_12, window_bounds = array<i64: 1, 96>}, {transform_indices = @transform_13, window_bounds = array<i64: 8, 128>}]} {
    %c0 = arith.constant 0 : index
    %c0_0 = arith.constant 0 : index
    %0 = vector.load %arg1[%c0, %c0_0] : memref<8x16xf32, #tpu.memory_space<vmem>>, vector<8x16xf32>
    %c0_1 = arith.constant 0 : index
    %c0_2 = arith.constant 0 : index
    %1 = vector.load %arg2[%c0_1, %c0_2] : memref<16x128xf32, #tpu.memory_space<vmem>>, vector<16x128xf32>
    %cst = arith.constant dense<0.000000e+00> : vector<8x128xf32>
    %2 = tpu.matmul %0, %1, %cst {dimension_numbers = #tpu.dot_dimension_numbers<[1], [0], [0], [1], [0, 0, 1, 1], [], []>, precision = #tpu.contract_precision<fp32>} : vector<8x16xf32>, vector<16x128xf32>, vector<8x128xf32> -> vector<8x128xf32>
    %c0_3 = arith.constant 0 : index
    %c0_4 = arith.constant 0 : index
    %3 = vector.load %arg3[%c0_3, %c0_4] : memref<1x128xf32, #tpu.memory_space<vmem>>, vector<1x128xf32>
    %4 = vector.broadcast %3 : vector<1x128xf32> to vector<8x128xf32>
    %5 = arith.addf %2, %4 : vector<8x128xf32>
    %cst_5 = arith.constant 0.000000e+00 : f32
    %6 = vector.broadcast %cst_5 : f32 to vector<8x128xf32>
    %7 = arith.maximumf %5, %6 : vector<8x128xf32>
    %c0_6 = arith.constant 0 : index
    %c0_7 = arith.constant 0 : index
    %8 = vector.load %arg4[%c0_6, %c0_7] : memref<128x64xf32, #tpu.memory_space<vmem>>, vector<128x64xf32>
    %cst_8 = arith.constant dense<0.000000e+00> : vector<8x64xf32>
    %9 = tpu.matmul %7, %8, %cst_8 {dimension_numbers = #tpu.dot_dimension_numbers<[1], [0], [0], [1], [0, 0, 1, 1], [], []>, precision = #tpu.contract_precision<fp32>} : vector<8x128xf32>, vector<128x64xf32>, vector<8x64xf32> -> vector<8x64xf32>
    %c0_9 = arith.constant 0 : index
    %c0_10 = arith.constant 0 : index
    %10 = vector.load %arg5[%c0_9, %c0_10] : memref<1x64xf32, #tpu.memory_space<vmem>>, vector<1x64xf32>
    %11 = vector.broadcast %10 : vector<1x64xf32> to vector<8x64xf32>
    %12 = arith.addf %9, %11 : vector<8x64xf32>
    %cst_11 = arith.constant 0.000000e+00 : f32
    %13 = vector.broadcast %cst_11 : f32 to vector<8x64xf32>
    %14 = arith.maximumf %12, %13 : vector<8x64xf32>
    %c0_12 = arith.constant 0 : index
    %c0_13 = arith.constant 0 : index
    %15 = vector.load %arg6[%c0_12, %c0_13] : memref<64x32xf32, #tpu.memory_space<vmem>>, vector<64x32xf32>
    %cst_14 = arith.constant dense<0.000000e+00> : vector<8x32xf32>
    %16 = tpu.matmul %14, %15, %cst_14 {dimension_numbers = #tpu.dot_dimension_numbers<[1], [0], [0], [1], [0, 0, 1, 1], [], []>, precision = #tpu.contract_precision<fp32>} : vector<8x64xf32>, vector<64x32xf32>, vector<8x32xf32> -> vector<8x32xf32>
    %c0_15 = arith.constant 0 : index
    %c0_16 = arith.constant 0 : index
    %17 = vector.load %arg7[%c0_15, %c0_16] : memref<1x32xf32, #tpu.memory_space<vmem>>, vector<1x32xf32>
    %18 = vector.broadcast %17 : vector<1x32xf32> to vector<8x32xf32>
    %19 = arith.addf %16, %18 : vector<8x32xf32>
    %cst_17 = arith.constant 0.000000e+00 : f32
    %20 = vector.broadcast %cst_17 : f32 to vector<8x32xf32>
    %21 = arith.maximumf %19, %20 : vector<8x32xf32>
    %c0_18 = arith.constant 0 : index
    %c0_19 = arith.constant 0 : index
    %22 = vector.load %arg8[%c0_18, %c0_19] : memref<32x64xf32, #tpu.memory_space<vmem>>, vector<32x64xf32>
    %cst_20 = arith.constant dense<0.000000e+00> : vector<8x64xf32>
    %23 = tpu.matmul %21, %22, %cst_20 {dimension_numbers = #tpu.dot_dimension_numbers<[1], [0], [0], [1], [0, 0, 1, 1], [], []>, precision = #tpu.contract_precision<fp32>} : vector<8x32xf32>, vector<32x64xf32>, vector<8x64xf32> -> vector<8x64xf32>
    %c0_21 = arith.constant 0 : index
    %c0_22 = arith.constant 0 : index
    %24 = vector.load %arg9[%c0_21, %c0_22] : memref<1x64xf32, #tpu.memory_space<vmem>>, vector<1x64xf32>
    %25 = vector.broadcast %24 : vector<1x64xf32> to vector<8x64xf32>
    %26 = arith.addf %23, %25 : vector<8x64xf32>
    %cst_23 = arith.constant 0.000000e+00 : f32
    %27 = vector.broadcast %cst_23 : f32 to vector<8x64xf32>
    %28 = arith.maximumf %26, %27 : vector<8x64xf32>
    %c0_24 = arith.constant 0 : index
    %c0_25 = arith.constant 0 : index
    %29 = vector.load %arg10[%c0_24, %c0_25] : memref<64x32xf32, #tpu.memory_space<vmem>>, vector<64x32xf32>
    %cst_26 = arith.constant dense<0.000000e+00> : vector<8x32xf32>
    %30 = tpu.matmul %28, %29, %cst_26 {dimension_numbers = #tpu.dot_dimension_numbers<[1], [0], [0], [1], [0, 0, 1, 1], [], []>, precision = #tpu.contract_precision<fp32>} : vector<8x64xf32>, vector<64x32xf32>, vector<8x32xf32> -> vector<8x32xf32>
    %c0_27 = arith.constant 0 : index
    %c0_28 = arith.constant 0 : index
    %31 = vector.load %arg11[%c0_27, %c0_28] : memref<1x32xf32, #tpu.memory_space<vmem>>, vector<1x32xf32>
    %32 = vector.broadcast %31 : vector<1x32xf32> to vector<8x32xf32>
    %33 = arith.addf %30, %32 : vector<8x32xf32>
    %cst_29 = arith.constant 0.000000e+00 : f32
    %34 = vector.broadcast %cst_29 : f32 to vector<8x32xf32>
    %35 = arith.maximumf %33, %34 : vector<8x32xf32>
    %c0_30 = arith.constant 0 : index
    %c0_31 = arith.constant 0 : index
    %36 = vector.load %arg14[%c0_30, %c0_31] : memref<8x128xf32, #tpu.memory_space<vmem>>, vector<8x32xf32>
    tpu.vector_store %arg14[%c0_30, %c0_31], %35 {strides = array<i32>} : memref<8x128xf32, #tpu.memory_space<vmem>>, vector<8x32xf32>,
    %c0_32 = arith.constant 0 : index
    %c0_33 = arith.constant 0 : index
    %37 = vector.load %arg12[%c0_32, %c0_33] : memref<32x96xf32, #tpu.memory_space<vmem>>, vector<32x96xf32>
    %cst_34 = arith.constant dense<0.000000e+00> : vector<8x96xf32>
    %38 = tpu.matmul %35, %37, %cst_34 {dimension_numbers = #tpu.dot_dimension_numbers<[1], [0], [0], [1], [0, 0, 1, 1], [], []>, precision = #tpu.contract_precision<fp32>} : vector<8x32xf32>, vector<32x96xf32>, vector<8x96xf32> -> vector<8x96xf32>
    %c0_35 = arith.constant 0 : index
    %c0_36 = arith.constant 0 : index
    %39 = vector.load %arg13[%c0_35, %c0_36] : memref<1x96xf32, #tpu.memory_space<vmem>>, vector<1x96xf32>
    %40 = vector.broadcast %39 : vector<1x96xf32> to vector<8x96xf32>
    %41 = arith.addf %38, %40 : vector<8x96xf32>
    %c0_37 = arith.constant 0 : index
    %c32 = arith.constant 32 : index
    %42 = vector.load %arg14[%c0_37, %c32] : memref<8x128xf32, #tpu.memory_space<vmem>>, vector<8x96xf32>
    tpu.vector_store %arg14[%c0_37, %c32], %41 {strides = array<i32>} : memref<8x128xf32, #tpu.memory_space<vmem>>, vector<8x96xf32>,
    return
  }
  func.func @transform_0(%arg0: i32) -> (i32, i32) {
    %c0_i32 = arith.constant 0 : i32
    %c0_i32_0 = arith.constant 0 : i32
    return %arg0, %c0_i32 : i32, i32
  }
  func.func @transform_1(%arg0: i32) -> (i32, i32) {
    %c0_i32 = arith.constant 0 : i32
    %c0_i32_0 = arith.constant 0 : i32
    %c0_i32_1 = arith.constant 0 : i32
    return %c0_i32, %c0_i32_0 : i32, i32
  }
  func.func @transform_2(%arg0: i32) -> (i32, i32) {
    %c0_i32 = arith.constant 0 : i32
    %c0_i32_0 = arith.constant 0 : i32
    %c0_i32_1 = arith.constant 0 : i32
    return %c0_i32, %c0_i32_0 : i32, i32
  }
  func.func @transform_3(%arg0: i32) -> (i32, i32) {
    %c0_i32 = arith.constant 0 : i32
    %c0_i32_0 = arith.constant 0 : i32
    %c0_i32_1 = arith.constant 0 : i32
    return %c0_i32, %c0_i32_0 : i32, i32
  }
  func.func @transform_4(%arg0: i32) -> (i32, i32) {
    %c0_i32 = arith.constant 0 : i32
    %c0_i32_0 = arith.constant 0 : i32
    %c0_i32_1 = arith.constant 0 : i32
    return %c0_i32, %c0_i32_0 : i32, i32
  }
  func.func @transform_5(%arg0: i32) -> (i32, i32) {
    %c0_i32 = arith.constant 0 : i32
    %c0_i32_0 = arith.constant 0 : i32
    %c0_i32_1 = arith.constant 0 : i32
    return %c0_i32, %c0_i32_0 : i32, i32
  }
  func.func @transform_6(%arg0: i32) -> (i32, i32) {
    %c0_i32 = arith.constant 0 : i32
    %c0_i32_0 = arith.constant 0 : i32
    %c0_i32_1 = arith.constant 0 : i32
    return %c0_i32, %c0_i32_0 : i32, i32
  }
  func.func @transform_7(%arg0: i32) -> (i32, i32) {
    %c0_i32 = arith.constant 0 : i32
    %c0_i32_0 = arith.constant 0 : i32
    %c0_i32_1 = arith.constant 0 : i32
    return %c0_i32, %c0_i32_0 : i32, i32
  }
  func.func @transform_8(%arg0: i32) -> (i32, i32) {
    %c0_i32 = arith.constant 0 : i32
    %c0_i32_0 = arith.constant 0 : i32
    %c0_i32_1 = arith.constant 0 : i32
    return %c0_i32, %c0_i32_0 : i32, i32
  }
  func.func @transform_9(%arg0: i32) -> (i32, i32) {
    %c0_i32 = arith.constant 0 : i32
    %c0_i32_0 = arith.constant 0 : i32
    %c0_i32_1 = arith.constant 0 : i32
    return %c0_i32, %c0_i32_0 : i32, i32
  }
  func.func @transform_10(%arg0: i32) -> (i32, i32) {
    %c0_i32 = arith.constant 0 : i32
    %c0_i32_0 = arith.constant 0 : i32
    %c0_i32_1 = arith.constant 0 : i32
    return %c0_i32, %c0_i32_0 : i32, i32
  }
  func.func @transform_11(%arg0: i32) -> (i32, i32) {
    %c0_i32 = arith.constant 0 : i32
    %c0_i32_0 = arith.constant 0 : i32
    %c0_i32_1 = arith.constant 0 : i32
    return %c0_i32, %c0_i32_0 : i32, i32
  }
  func.func @transform_12(%arg0: i32) -> (i32, i32) {
    %c0_i32 = arith.constant 0 : i32
    %c0_i32_0 = arith.constant 0 : i32
    %c0_i32_1 = arith.constant 0 : i32
    return %c0_i32, %c0_i32_0 : i32, i32
  }
  func.func @transform_13(%arg0: i32) -> (i32, i32) {
    %c0_i32 = arith.constant 0 : i32
    %c0_i32_0 = arith.constant 0 : i32
    return %arg0, %c0_i32 : i32, i32
  }
}

</mosaic_0001>

<bundles_post_ra>
// kernel: rede_neural_forward.1
= control target key start
LH: loop header
LB: loop body
LE: loop exit
PB: predicated region body
PF: predicated region fallthrough
CT: control target
= control target key end

     0   :  { %s2033_s25 = smov 0   ;;  %s2547_s0 = inlined_call_operand.vmem [shape: f32[16,16], index: 0, kind: input, shape index: {}]   ;;  %s2548_s1 = inlined_call_operand.vmem [shape: f32[16,128], index: 1, kind: input, shape index: {}]   ;;  %s2549_s2 = inlined_call_operand.vmem [shape: f32[1,128], index: 2, kind: input, shape index: {}]   ;;  %s2550_s3 = inlined_call_operand.vmem [shape: f32[128,64], index: 3, kind: input, shape index: {}]   ;;  %s2551_s4 = inlined_call_operand.vmem [shape: f32[1,64], index: 4, kind: input, shape index: {}]   ;;  %s2552_s5 = inlined_call_operand.vmem [shape: f32[64,32], index: 5, kind: input, shape index: {}]   ;;  %s2553_s6 = inlined_call_operand.vmem [shape: f32[1,32], index: 6, kind: input, shape index: {}]   ;;  %s2554_s7 = inlined_call_operand.vmem [shape: f32[32,64], index: 7, kind: input, shape index: {}]   ;;  %s2555_s8 = inlined_call_operand.vmem [shape: f32[1,64], index: 8, kind: input, shape index: {}]   ;;  %s2556_s9 = inlined_call_operand.vmem [shape: f32[64,32], index: 9, kind: input, shape index: {}]   ;;  %s2557_s10 = inlined_call_operand.vmem [shape: f32[1,32], index: 10, kind: input, shape index: {}]   ;;  %s2558_s11 = inlined_call_operand.vmem [shape: f32[32,96], index: 11, kind: input, shape index: {}]   ;;  %s2559_s12 = inlined_call_operand.vmem [shape: f32[1,96], index: 12, kind: input, shape index: {}]   ;;  %s2560_s13 = inlined_call_operand.vmem [shape: f32[16,128], index: 13, kind: output, shape index: {}]  }
   0x1 LB: > { %s1930_s26 = sadd.s32 4294967295, %s1960_s25   ;;  %p1934_p0 = scmp.ge.s32.totalorder %s1960_s25, 1  ;;  %s1960_s25 = sphi %s2033_s25, %s23_s25  }
   0x2   : > { %p386_p1 = scmp.lt.s32.totalorder %s1960_s25, 3 }
   0x4   : > { %p387_p2 = pnand %p1934_p0, %p386_p1 }
   0x5   : > { %p428_p3 = scmp.lt.s32.totalorder (!%p387_p2), %s1930_s26, 1  ;;  %s1962_s29 = smov (!%p387_p2), 32  }
   0x6   : > { %390 = sbr.rel (%p387_p2) target bundleno = 1061 (0x425), region = 72 }
   0xb   : > { %v438_v0 = vld [vmem:[%s2548_s1 + $0x8] sm:$0xff]  ;;  %v437_v1 = vld [vmem:[%s2548_s1] sm:$0xff]  ;;  %vm443_vm0 = vcmask 130048   ;;  %v622_v2 = vld [vmem:[%s2550_s3 + $0x78] sm:$0xff]  ;;  %s2562_s26 = smov (!%p428_p3, %s1930_s26), 1  ;;  %vm981_vm1 = vcmask 523264  }
   0xc   : > { %v2050_v3 = vand.u32 4294901760, %v438_v0  ;;  %v2052_v4 = vand.u32 4294901760, %v437_v1  ;;  %v2054_v5 = vand.u32 4294901760, %v622_v2  ;;  %v621_v6 = vld [vmem:[%s2550_s3 + $0x70] sm:$0xff]  ;;  %v620_v7 = vld [vmem:[%s2550_s3 + $0x68] sm:$0xff]  ;;  %v619_v8 = vld [vmem:[%s2550_s3 + $0x60] sm:$0xff] }
   0xd   : > { %v2067_v9 = vand.u32 4294901760, %v621_v6  ;;  %v2069_v10 = vand.u32 4294901760, %v620_v7  ;;  %v2071_v11 = vand.u32 4294901760, %v619_v8  ;;  %v618_v12 = vld [vmem:[%s2550_s3 + $0x58] sm:$0xff]  ;;  %v617_v13 = vld [vmem:[%s2550_s3 + $0x50] sm:$0xff]  ;;  %s1935_s28 = sshll.u32 %s2562_s26, 3 }
   0xe   : > { %v489_v14 = vsub.f32 %v438_v0, %v2050_v3  ;;  %462 = vmatpush.msra.mxu0 %v2050_v3  ;;  %v495_v15 = vsub.f32 %v437_v1, %v2052_v4  ;;  %546 = vmatpush.msra.mxu3 %v2050_v3  ;;  %v2084_v16 = vsub.f32 %v622_v2, %v2054_v5  ;;  %v2086_v17 = vand.u32 4294901760, %v618_v12  ;;  %s431_s14 = scalar_lea.vmem %s2547_s0, %s1935_s28  ;;  %v616_v31 = vld [vmem:[%s2550_s3 + $0x48] sm:$0xff]  ;;  %v615_v32 = vld [vmem:[%s2550_s3 + $0x40] sm:$0xff]  ;;  %v614_v37 = vld [vmem:[%s2550_s3 + $0x38] sm:$0xff]  ;;  %s2535_s27 = scalar_lea.vmem %s2560_s13, %s1935_s28 }
   0xf   : > { %v2090_v18 = vsub.f32 %v621_v6, %v2067_v9  ;;  %v2093_v19 = vsub.f32 %v620_v7, %v2069_v10  ;;  %v2096_v20 = vsub.f32 %v619_v8, %v2071_v11  ;;  %v2098_v21 = vand.u32 4294901760, %v617_v13  ;;  %v436_v26 = vld [vmem:[%s431_s14] sm:$0xff]  ;;  %v613_v38 = vld [vmem:[%s2550_s3 + $0x30] sm:$0xff]  ;;  %v612_v43 = vld [vmem:[%s2550_s3 + $0x28] sm:$0xff] }
  0x10   : > { %521 = vmatpush.msra.mxu2 %v489_v14  ;;  %464 = vmatpush.msra.mxu0 %v2052_v4  ;;  %v490_v22 = vand.u32 4294901760, %v489_v14  ;;  %v496_v23 = vand.u32 4294901760, %v495_v15  ;;  %v670_v24 = vand.u32 4294901760, %v2084_v16  ;;  %v2108_v25 = vsub.f32 %v618_v12, %v2086_v17  ;;  %v611_v55 = vld [vmem:[%s2550_s3 + $0x20] sm:$0xff]  ;;  %v610_v7 = vld [vmem:[%s2550_s3 + $0x18] sm:$0xff] }
  0x11   : > { %548 = vmatpush.msra.mxu3 %v2052_v4  ;;  %v676_v27 = vand.u32 4294901760, %v2090_v18  ;;  %v682_v28 = vand.u32 4294901760, %v2093_v19  ;;  %v688_v29 = vand.u32 4294901760, %v2096_v20  ;;  %v2115_v30 = vsub.f32 %v617_v13, %v2098_v21 }
  0x12   : > { %524 = vmatpush.msra.mxu2 %v495_v15  ;;  %v445_v33 = vsel %vm443_vm0, %v436_v26, 0  ;;  %v491_v34 = vsub.f32 %v489_v14, %v490_v22  ;;  %573 = vmatpush.msrb.mxu0 %v490_v22  ;;  %v497_v35 = vsub.f32 %v495_v15, %v496_v23  ;;  %v671_v36 = vsub.f32 %v2084_v16, %v670_v24  ;;  %v609_v15 = vld [vmem:[%s2550_s3 + $0x10] sm:$0xff] }
  0x13   : > { %v2133_v39 = vand.u32 4294901760, %v445_v33  ;;  %v677_v40 = vsub.f32 %v2090_v18, %v676_v27  ;;  %v683_v41 = vsub.f32 %v2093_v19, %v682_v28  ;;  %v689_v42 = vsub.f32 %v2096_v20, %v688_v29 }
  0x14   : > { %628 = vmatpush.msrb.mxu2 %v2054_v5  ;;  %v492_v44 = vand.u32 4294901760, %v491_v34  ;;  %v498_v45 = vand.u32 4294901760, %v497_v35  ;;  %577 = vmatpush.msrb.mxu0 %v496_v23  ;;  %v672_v46 = vand.u32 4294901760, %v671_v36  ;;  %v694_v47 = vand.u32 4294901760, %v2108_v25  ;;  %v607_v36 = vld [vmem:[%s2550_s3] sm:$0xff] }
  0x15   : > { %v466_v48 = vsub.f32 %v445_v33, %v2133_v39  ;;  %v678_v49 = vand.u32 4294901760, %v677_v40  ;;  %v684_v50 = vand.u32 4294901760, %v683_v41  ;;  %v700_v52 = vand.u32 4294901760, %v2115_v30 }
  0x16   : > { %630 = vmatpush.msrb.mxu2 %v2067_v9  ;;  %493 = vmatpush.msra.mxu1 %v492_v44  ;;  %v695_v51 = vsub.f32 %v2108_v25, %v694_v47  ;;  %v2155_v53 = vand.u32 4294901760, %v616_v31  ;;  %v2157_v54 = vand.u32 4294901760, %v615_v32  ;;  %v2162_v57 = vand.u32 4294901760, %v614_v37 }
  0x17   : > { %673 = vmatpush.msrb.mxu3 %v672_v46  ;;  %527 = vmatmul.f32.vlgmr.msra.gmra.mxu2 %v466_v48  ;;  %v467_v56 = vand.u32 4294901760, %v466_v48  ;;  %v2164_v58 = vand.u32 4294901760, %v613_v38  ;;  %v2166_v59 = vand.u32 4294901760, %v612_v43  ;;  %v690_v60 = vand.u32 4294901760, %v689_v42 }
  0x18   : > { %499 = vmatpush.msra.mxu1 %v498_v45  ;;  %v701_v61 = vsub.f32 %v2115_v30, %v700_v52  ;;  %v2172_v62 = vsub.f32 %v616_v31, %v2155_v53  ;;  %v2175_v63 = vsub.f32 %v615_v32, %v2157_v54  ;;  %v2179_v1 = vsub.f32 %v614_v37, %v2162_v57 }
  0x19   : > { %679 = vmatpush.msrb.mxu3 %v678_v49  ;;  %v468_v0 = vsub.f32 %v466_v48, %v467_v56  ;;  %501 = vmatmul.f32.vlgmr.msra.gmra.mxu1 %v2133_v39  ;;  %v2182_v2 = vsub.f32 %v613_v38, %v2164_v58  ;;  %v2184_v6 = vand.u32 4294901760, %v611_v55  ;;  %v696_v8 = vand.u32 4294901760, %v695_v51 }
  0x1a   : > { %552 = vmatmul.f32.vlgmr.msra.gmra.mxu3 %v467_v56  ;;  %598 = vmatpush.msrb.mxu1 %v2050_v3  ;;  %v706_v12 = vand.u32 4294901760, %v2172_v62  ;;  %v712_v13 = vand.u32 4294901760, %v2175_v63  ;;  %v2193_v14 = vsub.f32 %v612_v43, %v2166_v59  ;;  %v718_v23 = vand.u32 4294901760, %v2179_v1 }
  0x1b   : > { %685 = vmatpush.msrb.mxu3 %v684_v50  ;;  %v469_v22 = vand.u32 4294901760, %v468_v0  ;;  %632 = vmatpush.msrb.mxu2 %v2069_v10  ;;  %v724_v3 = vand.u32 4294901760, %v2182_v2  ;;  %v2202_v26 = vsub.f32 %v611_v55, %v2184_v6  ;;  %v702_v31 = vand.u32 4294901760, %v701_v61 }
  0x1c   : > { %600 = vmatpush.msrb.mxu1 %v2052_v4  ;;  %v707_v32 = vsub.f32 %v2172_v62, %v706_v12  ;;  %v713_v33 = vsub.f32 %v2175_v63, %v712_v13  ;;  %v2211_v34 = vand.u32 4294901760, %v610_v7  ;;  %v2214_v35 = vand.u32 4294901760, %v609_v15  ;;  %v608_v4 = vld [vmem:[%s2550_s3 + $0x8] sm:$0xff] }
  0x1d   : > { %691 = vmatpush.msrb.mxu3 %v690_v60  ;;  %470 = vmatmul.f32.vlgmr.msra.gmra.mxu0 %v469_v22  ;;  %v719_v38 = vsub.f32 %v2179_v1, %v718_v23  ;;  %v730_v40 = vand.u32 4294901760, %v2193_v14  ;;  %v725_v42 = vsub.f32 %v2182_v2, %v724_v3  ;;  %v736_v43 = vand.u32 4294901760, %v2202_v26 }
  0x1e   : > { %634 = vmatpush.msrb.mxu2 %v2071_v11  ;;  %v708_v37 = vand.u32 4294901760, %v707_v32  ;;  %v2227_v41 = vsub.f32 %v610_v7, %v2211_v34  ;;  %771 = vmatpush.msra.mxu0 %v2084_v16  ;;  %v714_v44 = vand.u32 4294901760, %v713_v33  ;;  %v2237_v45 = vsub.f32 %v609_v15, %v2214_v35 }
  0x1f   : > { %697 = vmatpush.msrb.mxu3 %v696_v8  ;;  %824 = vmatpush.msra.mxu1 %v2054_v5  ;;  %v2240_v46 = vand.u32 4294901760, %v608_v4  ;;  %v2242_v48 = vand.u32 4294901760, %v607_v36  ;;  %v720_v49 = vand.u32 4294901760, %v719_v38  ;;  %v731_v50 = vsub.f32 %v2193_v14, %v730_v40 }
  0x20   : > { %636 = vmatpush.msrb.mxu2 %v2086_v17  ;;  %774 = vmatpush.msra.mxu0 %v2090_v18  ;;  %v742_v51 = vand.u32 4294901760, %v2227_v41  ;;  %v726_v56 = vand.u32 4294901760, %v725_v42  ;;  %v737_v60 = vsub.f32 %v2202_v26, %v736_v43  ;;  %v748_v61 = vand.u32 4294901760, %v2237_v45 }
  0x21   : > { %703 = vmatpush.msrb.mxu3 %v702_v31  ;;  %602 = vmatmul.f32.vlgmr.msrb.gmra.mxu1 %v2133_v39  ;;  %v2251_v55 = vsub.f32 %v608_v4, %v2240_v46  ;;  %v2261_v0 = vsub.f32 %v607_v36, %v2242_v48  ;;  %v732_v7 = vand.u32 4294901760, %v731_v50  ;;  %v970_v50 = vld [vmem:[%s2552_s5 + $0x8] sm:$0xff]  ;;  %vm1231_vm2 = vcmask 261120  }
  0x22   : > { %638 = vmatpush.msrb.mxu2 %v2098_v21  ;;  %777 = vmatpush.msra.mxu0 %v2093_v19  ;;  %v743_v8 = vsub.f32 %v2227_v41, %v742_v51  ;;  %v738_v22 = vand.u32 4294901760, %v737_v60  ;;  %v1005_v60 = vand.u32 4294901760, %v970_v50  ;;  %vm1875_vm3 = vcmask 1047808  }
  0x23   : > { %709 = vmatpush.msrb.mxu3 %v708_v37  ;;  %826 = vmatpush.msra.mxu1 %v2067_v9  ;;  %v754_v15 = vand.u32 4294901760, %v2251_v55  ;;  %v760_v31 = vand.u32 4294901760, %v2261_v0 }
  0x24   : > { %640 = vmatpush.msrb.mxu2 %v2155_v53  ;;  %780 = vmatpush.msra.mxu0 %v2096_v20  ;;  %v744_v32 = vand.u32 4294901760, %v743_v8 }
  0x25   : > { %715 = vmatpush.msrb.mxu3 %v714_v44  ;;  %579 = vmatmul.f32.vlgmr.msrb.gmra.mxu0 %v2133_v39  ;;  %v749_v39 = vsub.f32 %v2237_v45, %v748_v61  ;;  %v755_v33 = vsub.f32 %v2251_v55, %v754_v15  ;;  %v761_v36 = vsub.f32 %v2261_v0, %v760_v31 }
  0x26   : > { %642 = vmatpush.msrb.mxu2 %v2157_v54  ;;  %828 = vmatpush.msra.mxu1 %v2069_v10 }
  0x27   : > { %721 = vmatpush.msrb.mxu3 %v720_v49  ;;  %783 = vmatpush.msra.mxu0 %v2108_v25  ;;  %v750_v4 = vand.u32 4294901760, %v749_v39  ;;  %v756_v37 = vand.u32 4294901760, %v755_v33  ;;  %v762_v38 = vand.u32 4294901760, %v761_v36 }
  0x28   : > { %644 = vmatpush.msrb.mxu2 %v2162_v57  ;;  %830 = vmatpush.msra.mxu1 %v2071_v11 }
  0x29   : > { %727 = vmatpush.msrb.mxu3 %v726_v56  ;;  %786 = vmatpush.msra.mxu0 %v2115_v30 }
  0x2a   : > { %646 = vmatpush.msrb.mxu2 %v2164_v58  ;;  %832 = vmatpush.msra.mxu1 %v2086_v17 }
  0x2b   : > { %733 = vmatpush.msrb.mxu3 %v732_v7  ;;  %789 = vmatpush.msra.mxu0 %v2172_v62 }
  0x2c   : > { %648 = vmatpush.msrb.mxu2 %v2166_v59  ;;  %834 = vmatpush.msra.mxu1 %v2098_v21 }
  0x2d   : > { %739 = vmatpush.msrb.mxu3 %v738_v22  ;;  %792 = vmatpush.msra.mxu0 %v2175_v63  ;;  %v974_v63 = vld [vmem:[%s2552_s5 + $0x28] sm:$0xff] }
  0x2e   : > { %650 = vmatpush.msrb.mxu2 %v2184_v6  ;;  %836 = vmatpush.msra.mxu1 %v2155_v53 }
  0x2f   : > { %745 = vmatpush.msrb.mxu3 %v744_v32  ;;  %795 = vmatpush.msra.mxu0 %v2179_v1 }
  0x30   : > { %652 = vmatpush.msrb.mxu2 %v2211_v34  ;;  %838 = vmatpush.msra.mxu1 %v2157_v54 }
  0x31   : > { %751 = vmatpush.msrb.mxu3 %v750_v4  ;;  %798 = vmatpush.msra.mxu0 %v2182_v2 }
  0x32   : > { %654 = vmatpush.msrb.mxu2 %v2214_v35  ;;  %840 = vmatpush.msra.mxu1 %v2162_v57 }
  0x33   : > { %757 = vmatpush.msrb.mxu3 %v756_v37  ;;  %801 = vmatpush.msra.mxu0 %v2193_v14 }
  0x34   : > { %656 = vmatpush.msrb.mxu2 %v2240_v46  ;;  %842 = vmatpush.msra.mxu1 %v2164_v58 }
  0x35   : > { %763 = vmatpush.msrb.mxu3 %v762_v38  ;;  %804 = vmatpush.msra.mxu0 %v2202_v26  ;;  %v972_v26 = vld [vmem:[%s2552_s5 + $0x18] sm:$0xff] }
  0x36   : > { %658 = vmatpush.msrb.mxu2 %v2242_v48  ;;  %844 = vmatpush.msra.mxu1 %v2166_v59  ;;  %v1001_v42 = vand.u32 4294901760, %v972_v26 }
  0x37   : > { %932 = vmatpush.msra.mxu3 %v2054_v5  ;;  %807 = vmatpush.msra.mxu0 %v2227_v41  ;;  %v1948_v5 = vld [vmem:[%s2549_s2] ss:$0 sm:$0xff] }
  0x38   : > { %865 = vmatpush.msra.mxu2 %v670_v24  ;;  %846 = vmatpush.msra.mxu1 %v2184_v6  ;;  %v1051_v49 = vsub.f32 %v972_v26, %v1001_v42 }
  0x39   : > { %934 = vmatpush.msra.mxu3 %v2067_v9  ;;  %810 = vmatpush.msra.mxu0 %v2237_v45 }
  0x3a   : > { %869 = vmatpush.msra.mxu2 %v676_v27  ;;  %848 = vmatpush.msra.mxu1 %v2211_v34 }
  0x3b   : > { %936 = vmatpush.msra.mxu3 %v2069_v10  ;;  %813 = vmatpush.msra.mxu0 %v2251_v55 }
  0x3c   : > { %873 = vmatpush.msra.mxu2 %v682_v28  ;;  %850 = vmatpush.msra.mxu1 %v2214_v35 }
  0x3d   : > { %938 = vmatpush.msra.mxu3 %v2071_v11  ;;  %816 = vmatpush.msra.mxu0 %v2261_v0  ;;  %v969_v0 = vld [vmem:[%s2552_s5] sm:$0xff] }
  0x3e   : > { %877 = vmatpush.msra.mxu2 %v688_v29  ;;  %852 = vmatpush.msra.mxu1 %v2240_v46  ;;  %v1007_v22 = vand.u32 4294901760, %v969_v0 }
  0x3f   : > { %940 = vmatpush.msra.mxu3 %v2086_v17 }
  0x40   : > { %881 = vmatpush.msra.mxu2 %v694_v47  ;;  %854 = vmatpush.msra.mxu1 %v2242_v48  ;;  %v1069_v33 = vsub.f32 %v969_v0, %v1007_v22 }
  0x41   : > { %942 = vmatpush.msra.mxu3 %v2098_v21 }
  0x42   : > { %885 = vmatpush.msra.mxu2 %v700_v52  ;;  %v1070_v38 = vand.u32 4294901760, %v1069_v33 }
  0x43   : > { %944 = vmatpush.msra.mxu3 %v2155_v53 }
  0x44   : > { %889 = vmatpush.msra.mxu2 %v706_v12  ;;  %v973_v12 = vld [vmem:[%s2552_s5 + $0x20] sm:$0xff] }
  0x45   : > { %946 = vmatpush.msra.mxu3 %v2157_v54  ;;  %v976_v54 = vld [vmem:[%s2552_s5 + $0x38] sm:$0xff] }
  0x46   : > { %893 = vmatpush.msra.mxu2 %v712_v13 }
  0x47   : > { %948 = vmatpush.msra.mxu3 %v2162_v57  ;;  %v2368_v57 = vand.u32 4294901760, %v976_v54 }
  0x48   : > { %897 = vmatpush.msra.mxu2 %v718_v23 }
  0x49   : > { %950 = vmatpush.msra.mxu3 %v2164_v58  ;;  %v975_v58 = vld [vmem:[%s2552_s5 + $0x30] sm:$0xff]  ;;  %994 = vmatpush.msrb.mxu0 %v2368_v57 }
  0x4a   : > { %901 = vmatpush.msra.mxu2 %v724_v3  ;;  %v2376_v62 = vand.u32 4294901760, %v975_v58  ;;  %v2399_v3 = vand.u32 4294901760, %v973_v12 }
  0x4b   : > { %952 = vmatpush.msra.mxu3 %v2166_v59  ;;  %v2374_v59 = vsub.f32 %v976_v54, %v2368_v57 }
  0x4c   : > { %905 = vmatpush.msra.mxu2 %v730_v40  ;;  %v2385_v2 = vsub.f32 %v975_v58, %v2376_v62  ;;  %996 = vmatpush.msrb.mxu0 %v2376_v62  ;;  %v1045_v41 = vsub.f32 %v973_v12, %v2399_v3  ;;  %v1224_v12 = vld [vmem:[%s2554_s7 + $0x8] sm:$0xff] }
  0x4d   : > { %954 = vmatpush.msra.mxu3 %v2184_v6  ;;  %v1028_v1 = vand.u32 4294901760, %v2374_v59  ;;  %v2387_v6 = vand.u32 4294901760, %v974_v63 }
  0x4e   : > { %909 = vmatpush.msra.mxu2 %v736_v43  ;;  %v1034_v14 = vand.u32 4294901760, %v2385_v2  ;;  %v971_v43 = vld [vmem:[%s2552_s5 + $0x10] sm:$0xff] }
  0x4f   : > { %956 = vmatpush.msra.mxu3 %v2211_v34  ;;  %v1029_v13 = vsub.f32 %v2374_v59, %v1028_v1  ;;  %v2397_v23 = vsub.f32 %v974_v63, %v2387_v6  ;;  %998 = vmatpush.msrb.mxu0 %v2387_v6 }
  0x50   : > { %913 = vmatpush.msra.mxu2 %v742_v51 }
  0x51   : > { %958 = vmatpush.msra.mxu3 %v2214_v35  ;;  %v1030_v34 = vand.u32 4294901760, %v1029_v13  ;;  %v1035_v35 = vsub.f32 %v2385_v2, %v1034_v14  ;;  %v1040_v40 = vand.u32 4294901760, %v2397_v23  ;;  %1000 = vmatpush.msrb.mxu0 %v2399_v3 }
  0x52   : > { %917 = vmatpush.msra.mxu2 %v748_v61  ;;  %v1052_v61 = vand.u32 4294901760, %v1051_v49 }
  0x53   : > { %960 = vmatpush.msra.mxu3 %v2240_v46  ;;  %1031 = vmatpush.msrb.mxu1 %v1030_v34  ;;  %v1036_v44 = vand.u32 4294901760, %v1035_v35  ;;  %v1041_v45 = vsub.f32 %v2397_v23, %v1040_v40  ;;  %v1046_v46 = vand.u32 4294901760, %v1045_v41 }
  0x54   : > { %921 = vmatpush.msra.mxu2 %v754_v15  ;;  %1002 = vmatpush.msrb.mxu0 %v1001_v42  ;;  %v1063_v15 = vsub.f32 %v970_v50, %v1005_v60  ;;  %v1053_v39 = vsub.f32 %v1051_v49, %v1052_v61 }
  0x55   : > { %962 = vmatpush.msra.mxu3 %v2242_v48  ;;  %v1003_v48 = vand.u32 4294901760, %v971_v43  ;;  %1037 = vmatpush.msrb.mxu1 %v1036_v44  ;;  %v1042_v51 = vand.u32 4294901760, %v1041_v45  ;;  %v1047_v55 = vsub.f32 %v1045_v41, %v1046_v46 }
  0x56   : > { %925 = vmatpush.msra.mxu2 %v760_v31  ;;  %v1064_v32 = vand.u32 4294901760, %v1063_v15  ;;  %v1054_v4 = vand.u32 4294901760, %v1053_v39 }
  0x57   : > { %v1057_v56 = vsub.f32 %v971_v43, %v1003_v48  ;;  %1004 = vmatpush.msrb.mxu0 %v1003_v48  ;;  %1043 = vmatpush.msrb.mxu1 %v1042_v51  ;;  %v1048_v7 = vand.u32 4294901760, %v1047_v55  ;;  %v1950_v55 = vld [vmem:[%s2553_s6] ss:$0 sm:$0xff] }
  0x58   : > { %v1065_v37 = vsub.f32 %v1063_v15, %v1064_v32 }
  0x59   : > { %v1058_v8 = vand.u32 4294901760, %v1057_v56  ;;  %1049 = vmatpush.msrb.mxu1 %v1048_v7  ;;  %1006 = vmatpush.msrb.mxu0 %v1005_v60 }
  0x5b   : > { %v1059_v31 = vsub.f32 %v1057_v56, %v1058_v8  ;;  %1008 = vmatpush.msrb.mxu0 %v1007_v22  ;;  %1055 = vmatpush.msrb.mxu1 %v1054_v4 }
  0x5d   : > { %v1060_v36 = vand.u32 4294901760, %v1059_v31 }
  0x5f   : > { %1061 = vmatpush.msrb.mxu1 %v1060_v36 }
  0x96   : > { %v502_v9 = vpop.f32.mrf.mxu1 }
  0x9a   : > { %v471_v10 = vpop.f32.mrf.mxu0  ;;  %v528_v16 = vpop.f32.mrf.mxu2 }
  0x9b   : > { %v472_v11 = vadd.f32 %v1948_v5, %v471_v10  ;;  %v1066_v5 = vand.u32 4294901760, %v1065_v37 }
  0x9d   : > { %v503_v17 = vadd.f32 %v502_v9, %v472_v11  ;;  %v553_v18 = vpop.f32.mrf.mxu3  ;;  %v1071_v9 = vsub.f32 %v1069_v33, %v1070_v38  ;;  %1067 = vmatpush.msrb.mxu1 %v1066_v5  ;;  %v1949_v11 = vld [vmem:[%s2551_s4] ss:$0 sm:$0xff] }
  0x9e   : > { %v603_v24 = vpop.f32.mrf.mxu1 }
  0x9f   : > { %v529_v19 = vadd.f32 %v528_v16, %v503_v17  ;;  %v1072_v10 = vand.u32 4294901760, %v1071_v9 }
  0xa1   : > { %v554_v20 = vadd.f32 %v553_v18, %v529_v19  ;;  %1073 = vmatpush.msrb.mxu1 %v1072_v10 }
  0xa2   : > { %v580_v21 = vpop.f32.mrf.mxu0 }
  0xa3   : > { %v581_v25 = vadd.f32 %v580_v21, %v554_v20 }
  0xa5   : > { %v604_v27 = vadd.f32 %v603_v24, %v581_v25 }
  0xa7   : > { %v606_v28 = vmax.f32 %v604_v27, 0.0 }
  0xa9   : > { %v659_v29 = vand.u32 4294901760, %v606_v28 }
  0xab   : > { %v660_v30 = vsub.f32 %v606_v28, %v659_v29  ;;  %765 = vmatmul.f32.vlgmr.msrb.gmra.mxu3 %v659_v29 }
  0xac   : > { %1202 = vmatpush.msrb.mxu3 %v2368_v57 }
  0xad   : > { %819 = vmatmul.f32.vlgmr.msra.gmra.mxu0 %v660_v30  ;;  %v661_v47 = vand.u32 4294901760, %v660_v30 }
  0xae   : > { %1204 = vmatpush.msrb.mxu3 %v2376_v62  ;;  %1089 = vmatpush.msra.mxu0 %v2374_v59 }
  0xaf   : > { %858 = vmatmul.f32.vlgmr.msra.gmra.mxu1 %v661_v47  ;;  %v662_v52 = vsub.f32 %v660_v30, %v661_v47 }
  0xb0   : > { %1206 = vmatpush.msrb.mxu3 %v2387_v6  ;;  %1092 = vmatpush.msra.mxu0 %v2385_v2 }
  0xb1   : > { %v663_v53 = vand.u32 4294901760, %v662_v52  ;;  %1126 = vmatpush.msra.mxu1 %v2368_v57 }
  0xb2   : > { %1208 = vmatpush.msrb.mxu3 %v2399_v3  ;;  %1095 = vmatpush.msra.mxu0 %v2397_v23  ;;  %v1251_v23 = vand.u32 4294901760, %v1224_v12 }
  0xb3   : > { %664 = vmatmul.f32.vlgmr.msrb.gmra.mxu2 %v663_v53  ;;  %964 = vmatmul.f32.vlgmr.msra.gmra.mxu3 %v659_v29 }
  0xb4   : > { %1159 = vmatpush.msrb.mxu2 %v1028_v1  ;;  %1210 = vmatpush.msrb.mxu3 %v1001_v42  ;;  %v1225_v1 = vld [vmem:[%s2554_s7 + $0x10] sm:$0xff]  ;;  %v1289_v35 = vsub.f32 %v1224_v12, %v1251_v23 }
  0xb5   : > { %1098 = vmatpush.msra.mxu0 %v1045_v41  ;;  %1128 = vmatpush.msra.mxu1 %v2376_v62  ;;  %v1226_v62 = vld [vmem:[%s2554_s7 + $0x18] sm:$0xff] }
  0xb6   : > { %1163 = vmatpush.msrb.mxu2 %v1034_v14  ;;  %1212 = vmatpush.msrb.mxu3 %v1003_v48  ;;  %v1247_v63 = vand.u32 4294901760, %v1226_v62  ;;  %v1290_v43 = vand.u32 4294901760, %v1289_v35 }
  0xb7   : > { %1101 = vmatpush.msra.mxu0 %v1051_v49  ;;  %1130 = vmatpush.msra.mxu1 %v2387_v6  ;;  %v1249_v6 = vand.u32 4294901760, %v1225_v1 }
  0xb8   : > { %1167 = vmatpush.msrb.mxu2 %v1040_v40  ;;  %1214 = vmatpush.msrb.mxu3 %v1005_v60  ;;  %v1277_v2 = vsub.f32 %v1226_v62, %v1247_v63  ;;  %v1423_v62 = vld [vmem:[%s2556_s9 + $0x10] sm:$0xff] }
  0xb9   : > { %1104 = vmatpush.msra.mxu0 %v1057_v56  ;;  %1132 = vmatpush.msra.mxu1 %v2399_v3  ;;  %v1283_v14 = vsub.f32 %v1225_v1, %v1249_v6  ;;  %v1223_v3 = vld [vmem:[%s2554_s7] sm:$0xff] }
  0xba   : > { %1171 = vmatpush.msrb.mxu2 %v1046_v46  ;;  %1216 = vmatpush.msrb.mxu3 %v1007_v22  ;;  %v1278_v13 = vand.u32 4294901760, %v1277_v2  ;;  %v1253_v40 = vand.u32 4294901760, %v1223_v3  ;;  %v1291_v46 = vsub.f32 %v1289_v35, %v1290_v43 }
  0xbb   : > { %927 = vmatmul.f32.vlgmr.msra.gmra.mxu2 %v659_v29  ;;  %1107 = vmatpush.msra.mxu0 %v1063_v15  ;;  %v1284_v34 = vand.u32 4294901760, %v1283_v14 }
  0xbc   : > { %1175 = vmatpush.msrb.mxu2 %v1052_v61  ;;  %1134 = vmatpush.msra.mxu1 %v1001_v42  ;;  %v1279_v26 = vsub.f32 %v1277_v2, %v1278_v13  ;;  %v1295_v44 = vsub.f32 %v1223_v3, %v1253_v40  ;;  %v1292_v49 = vand.u32 4294901760, %v1291_v46 }
  0xbd   : > { %1110 = vmatpush.msra.mxu0 %v1069_v33  ;;  %1408 = vmatpush.msra.mxu3 %v1247_v63  ;;  %v1285_v42 = vsub.f32 %v1283_v14, %v1284_v34 }
  0xbe   : > { %1179 = vmatpush.msrb.mxu2 %v1058_v8  ;;  %1136 = vmatpush.msra.mxu1 %v1003_v48  ;;  %v1280_v41 = vand.u32 4294901760, %v1279_v26  ;;  %v1296_v48 = vand.u32 4294901760, %v1295_v44 }
  0xbf   : > { %1410 = vmatpush.msra.mxu3 %v1249_v6  ;;  %v1286_v45 = vand.u32 4294901760, %v1285_v42 }
  0xc0   : > { %1183 = vmatpush.msrb.mxu2 %v1064_v32  ;;  %1138 = vmatpush.msra.mxu1 %v1005_v60  ;;  %v1297_v50 = vsub.f32 %v1295_v44, %v1296_v48 }
  0xc1   : > { %1412 = vmatpush.msra.mxu3 %v1251_v23 }
  0xc2   : > { %1187 = vmatpush.msrb.mxu2 %v1070_v38  ;;  %1140 = vmatpush.msra.mxu1 %v1007_v22  ;;  %v1298_v51 = vand.u32 4294901760, %v1297_v50 }
  0xc3   : > { %1414 = vmatpush.msra.mxu3 %v1253_v40 }
  0xc4   : > { %1377 = vmatpush.msra.mxu2 %v1278_v13  ;;  %v1422_v13 = vld [vmem:[%s2556_s9 + $0x8] sm:$0xff] }
  0xc5   : > { %v1456_v26 = vand.u32 4294901760, %v1422_v13 }
  0xc6   : > { %1381 = vmatpush.msra.mxu2 %v1284_v34 }
  0xc7   : > { %v1514_v42 = vsub.f32 %v1422_v13, %v1456_v26 }
  0xc8   : > { %1385 = vmatpush.msra.mxu2 %v1290_v43 }
  0xc9   : > { %v1515_v46 = vand.u32 4294901760, %v1514_v42 }
  0xca   : > { %1389 = vmatpush.msra.mxu2 %v1296_v48 }
 0x12a   : > { %v820_v20 = vpop.f32.mrf.mxu0 }
 0x12c   : > { %v859_v24 = vpop.f32.mrf.mxu1 }
 0x12e   : > { %v766_v16 = vpop.f32.mrf.mxu3 }
 0x136   : > { %v665_v17 = vpop.f32.mrf.mxu2  ;;  %v965_v29 = vpop.f32.mrf.mxu3 }
 0x137   : > { %v666_v18 = vadd.f32 %v1949_v11, %v665_v17  ;;  %v1428_v11 = vld [vmem:[%s2556_s9 + $0x38] sm:$0xff]  ;;  %v1427_v17 = vld [vmem:[%s2556_s9 + $0x30] sm:$0xff] }
 0x139   : > { %v767_v19 = vadd.f32 %v766_v16, %v666_v18  ;;  %v2451_v16 = vand.u32 4294901760, %v1428_v11 }
 0x13b   : > { %v821_v21 = vadd.f32 %v820_v20, %v767_v19  ;;  %v2457_v18 = vsub.f32 %v1428_v11, %v2451_v16  ;;  %v2459_v19 = vand.u32 4294901760, %v1427_v17  ;;  %v1426_v20 = vld [vmem:[%s2556_s9 + $0x28] sm:$0xff] }
 0x13d   : > { %v860_v25 = vadd.f32 %v859_v24, %v821_v21  ;;  %v1479_v21 = vand.u32 4294901760, %v2457_v18  ;;  %v2468_v24 = vsub.f32 %v1427_v17, %v2459_v19 }
 0x13e   : > { %v928_v27 = vpop.f32.mrf.mxu2 }
 0x13f   : > { %v929_v28 = vadd.f32 %v928_v27, %v860_v25  ;;  %v2470_v25 = vand.u32 4294901760, %v1426_v20  ;;  %v1425_v27 = vld [vmem:[%s2556_s9 + $0x20] sm:$0xff] }
 0x141   : > { %v966_v30 = vadd.f32 %v965_v29, %v929_v28  ;;  %v1480_v28 = vsub.f32 %v2457_v18, %v1479_v21  ;;  %v1485_v29 = vand.u32 4294901760, %v2468_v24 }
 0x143   : > { %v968_v47 = vmax.f32 %v966_v30, 0.0  ;;  %v2481_v30 = vsub.f32 %v1426_v20, %v2470_v25 }
 0x145   : > { %v983_v52 = vsel %vm981_vm1, %v968_v47, 0  ;;  %v2483_v47 = vand.u32 4294901760, %v1425_v27 }
 0x146   : > { %v1009_v53 = vand.u32 4294901760, %v983_v52 }
 0x148   : > { %v1010_v54 = vsub.f32 %v983_v52, %v1009_v53  ;;  %1075 = vmatmul.f32.vlgmr.msrb.gmra.mxu1 %v1009_v53  ;;  %1189 = vmatmul.f32.vlgmr.msrb.gmra.mxu2 %v1009_v53  ;;  %v1424_v52 = vld [vmem:[%s2556_s9 + $0x18] sm:$0xff] }
 0x149   : > { %1218 = vmatmul.f32.vlgmr.msrb.gmra.mxu3 %v1009_v53  ;;  %1281 = vmatpush.msrb.mxu1 %v1280_v41  ;;  %v1481_v53 = vand.u32 4294901760, %v1480_v28 }
 0x14a   : > { %v1011_v57 = vand.u32 4294901760, %v1010_v54  ;;  %1577 = vmatpush.msrb.mxu3 %v2451_v16  ;;  %1540 = vmatpush.msrb.mxu2 %v2457_v18 }
 0x14b   : > { %1287 = vmatpush.msrb.mxu1 %v1286_v45 }
 0x14c   : > { %v1012_v58 = vsub.f32 %v1010_v54, %v1011_v57  ;;  %1579 = vmatpush.msrb.mxu3 %v2459_v19  ;;  %1543 = vmatpush.msrb.mxu2 %v2468_v24 }
 0x14d   : > { %1293 = vmatpush.msrb.mxu1 %v1292_v49 }
 0x14e   : > { %v1013_v59 = vand.u32 4294901760, %v1012_v58  ;;  %1581 = vmatpush.msrb.mxu3 %v2470_v25  ;;  %v1496_v58 = vsub.f32 %v1425_v27, %v2483_v47  ;;  %1546 = vmatpush.msrb.mxu2 %v2481_v30  ;;  %v1676_v27 = vld [vmem:[%s2558_s11 + $0x8] sm:$0xff] }
 0x14f   : > { %1299 = vmatpush.msrb.mxu1 %v1298_v51  ;;  %v1516_v51 = vsub.f32 %v1514_v42, %v1515_v46 }
 0x150   : > { %1014 = vmatmul.f32.vlgmr.msrb.gmra.mxu0 %v1013_v59  ;;  %1144 = vmatmul.f32.vlgmr.msra.gmra.mxu1 %v1011_v57  ;;  %v1491_v57 = vand.u32 4294901760, %v2481_v30  ;;  %v1452_v59 = vand.u32 4294901760, %v1424_v52 }
 0x151   : > { %1248 = vmatpush.msrb.mxu0 %v1247_v63  ;;  %1348 = vmatpush.msra.mxu1 %v1247_v63 }
 0x152   : > { %1583 = vmatpush.msrb.mxu3 %v2483_v47  ;;  %v1492_v1 = vsub.f32 %v2481_v30, %v1491_v57  ;;  %1549 = vmatpush.msrb.mxu2 %v1496_v58  ;;  %v1502_v12 = vsub.f32 %v1424_v52, %v1452_v59  ;;  %v1702_v30 = vand.u32 4294901760, %v1676_v27 }
 0x153   : > { %1250 = vmatpush.msrb.mxu0 %v1249_v6  ;;  %1350 = vmatpush.msra.mxu1 %v1249_v6  ;;  %v1454_v6 = vand.u32 4294901760, %v1423_v62 }
 0x154   : > { %1585 = vmatpush.msrb.mxu3 %v1452_v59  ;;  %v1503_v34 = vand.u32 4294901760, %v1502_v12  ;;  %1552 = vmatpush.msrb.mxu2 %v1502_v12 }
 0x155   : > { %1252 = vmatpush.msrb.mxu0 %v1251_v23  ;;  %1352 = vmatpush.msra.mxu1 %v1251_v23  ;;  %v1508_v3 = vsub.f32 %v1423_v62, %v1454_v6 }
 0x156   : > { %1587 = vmatpush.msrb.mxu3 %v1454_v6 }
 0x157   : > { %1254 = vmatpush.msrb.mxu0 %v1253_v40  ;;  %1354 = vmatpush.msra.mxu1 %v1253_v40  ;;  %v1509_v41 = vand.u32 4294901760, %v1508_v3 }
 0x158   : > { %1113 = vmatmul.f32.vlgmr.msra.gmra.mxu0 %v1010_v54  ;;  %v1486_v54 = vsub.f32 %v2468_v24, %v1485_v29  ;;  %1555 = vmatpush.msrb.mxu2 %v1508_v3 }
 0x159   : > { %1319 = vmatpush.msra.mxu0 %v1277_v2  ;;  %v1497_v2 = vand.u32 4294901760, %v1496_v58  ;;  %v1510_v45 = vsub.f32 %v1508_v3, %v1509_v41  ;;  %1589 = vmatpush.msrb.mxu3 %v1456_v26 }
 0x15a   : > { %v1487_v63 = vand.u32 4294901760, %v1486_v54  ;;  %1558 = vmatpush.msrb.mxu2 %v1514_v42  ;;  %v1740_v54 = vsub.f32 %v1676_v27, %v1702_v30 }
 0x15b   : > { %1322 = vmatpush.msra.mxu0 %v1283_v14  ;;  %v1493_v14 = vand.u32 4294901760, %v1492_v1  ;;  %v1498_v23 = vsub.f32 %v1496_v58, %v1497_v2  ;;  %v1511_v50 = vand.u32 4294901760, %v1510_v45 }
 0x15c   : > { %v1741_v62 = vand.u32 4294901760, %v1740_v54 }
 0x15d   : > { %1325 = vmatpush.msra.mxu0 %v1289_v35  ;;  %v1421_v35 = vld [vmem:[%s2556_s9] sm:$0xff]  ;;  %v1499_v40 = vand.u32 4294901760, %v1498_v23 }
 0x15e   : > { %v1458_v43 = vand.u32 4294901760, %v1421_v35  ;;  %v1952_v23 = vld [vmem:[%s2557_s10] ss:$0 sm:$0xff] }
 0x15f   : > { %1328 = vmatpush.msra.mxu0 %v1295_v44  ;;  %v1504_v44 = vsub.f32 %v1502_v12, %v1503_v34 }
 0x160   : > { %v1520_v48 = vsub.f32 %v1421_v35, %v1458_v43  ;;  %1591 = vmatpush.msrb.mxu3 %v1458_v43 }
 0x161   : > { %v1505_v49 = vand.u32 4294901760, %v1504_v44 }
 0x162   : > { %1561 = vmatpush.msrb.mxu2 %v1520_v48 }
 0x1c5   : > { %v1076_v56 = vpop.f32.mrf.mxu1 }
 0x1cb   : > { %v1190_v39 = vpop.f32.mrf.mxu2 }
 0x1cc   : > { %v1219_v32 = vpop.f32.mrf.mxu3 }
 0x1cd   : > { %v1015_v60 = vpop.f32.mrf.mxu0  ;;  %v1145_v15 = vpop.f32.mrf.mxu1 }
 0x1ce   : > { %v1016_v61 = vadd.f32 %v1950_v55, %v1015_v60  ;;  %v1521_v55 = vand.u32 4294901760, %v1520_v48 }
 0x1d0   : > { %v1077_v0 = vadd.f32 %v1076_v56, %v1016_v61  ;;  %v1517_v56 = vand.u32 4294901760, %v1516_v51  ;;  %v1522_v60 = vsub.f32 %v1520_v48, %v1521_v55 }
 0x1d2   : > { %v1523_v61 = vand.u32 4294901760, %v1522_v60 }
 0x1d5   : > { %v1114_v7 = vpop.f32.mrf.mxu0 }
 0x1d6   : > { %v1115_v8 = vadd.f32 %v1114_v7, %v1077_v0  ;;  %v1951_v0 = vld [vmem:[%s2555_s8] ss:$0 sm:$0xff] }
 0x1d8   : > { %v1146_v22 = vadd.f32 %v1145_v15, %v1115_v8 }
 0x1da   : > { %v1191_v31 = vadd.f32 %v1190_v39, %v1146_v22 }
 0x1dc   : > { %v1220_v33 = vadd.f32 %v1219_v32, %v1191_v31 }
 0x1de   : > { %v1222_v4 = vmax.f32 %v1220_v33, 0.0 }
 0x1e0   : > { %v1233_v36 = vsel %vm1231_vm2, %v1222_v4, 0 }
 0x1e1   : > { %v1255_v37 = vand.u32 4294901760, %v1233_v36 }
 0x1e3   : > { %v1256_v38 = vsub.f32 %v1233_v36, %v1255_v37  ;;  %1301 = vmatmul.f32.vlgmr.msrb.gmra.mxu1 %v1255_v37  ;;  %1391 = vmatmul.f32.vlgmr.msra.gmra.mxu2 %v1255_v37 }
 0x1e4   : > { %1416 = vmatmul.f32.vlgmr.msra.gmra.mxu3 %v1255_v37  ;;  %1482 = vmatpush.msrb.mxu1 %v1481_v53 }
 0x1e5   : > { %v1257_v5 = vand.u32 4294901760, %v1256_v38 }
 0x1e6   : > { %1488 = vmatpush.msrb.mxu1 %v1487_v63 }
 0x1e7   : > { %v1258_v9 = vsub.f32 %v1256_v38, %v1257_v5 }
 0x1e8   : > { %1494 = vmatpush.msrb.mxu1 %v1493_v14 }
 0x1e9   : > { %v1259_v10 = vand.u32 4294901760, %v1258_v9 }
 0x1ea   : > { %1500 = vmatpush.msrb.mxu1 %v1499_v40 }
 0x1eb   : > { %1260 = vmatmul.f32.vlgmr.msrb.gmra.mxu0 %v1259_v10  ;;  %1358 = vmatmul.f32.vlgmr.msra.gmra.mxu1 %v1257_v5 }
 0x1ec   : > { %1445 = vmatpush.msrb.mxu0 %v2451_v16  ;;  %1506 = vmatpush.msrb.mxu1 %v1505_v49 }
 0x1ee   : > { %1447 = vmatpush.msrb.mxu0 %v2459_v19  ;;  %1512 = vmatpush.msrb.mxu1 %v1511_v50 }
 0x1f0   : > { %1449 = vmatpush.msrb.mxu0 %v2470_v25  ;;  %1518 = vmatpush.msrb.mxu1 %v1517_v56 }
 0x1f2   : > { %1451 = vmatpush.msrb.mxu0 %v2483_v47  ;;  %1524 = vmatpush.msrb.mxu1 %v1523_v61 }
 0x1f3   : > { %1331 = vmatmul.f32.vlgmr.msra.gmra.mxu0 %v1256_v38 }
 0x1f4   : > { %1453 = vmatpush.msrb.mxu0 %v1452_v59  ;;  %1653 = vmatpush.msra.mxu1 %v2451_v16 }
 0x1f6   : > { %1455 = vmatpush.msrb.mxu0 %v1454_v6  ;;  %1655 = vmatpush.msra.mxu1 %v2459_v19  ;;  %v1678_v19 = vld [vmem:[%s2558_s11 + $0x18] sm:$0xff] }
 0x1f7   : > { %v1698_v20 = vand.u32 4294901760, %v1678_v19 }
 0x1f8   : > { %1457 = vmatpush.msrb.mxu0 %v1456_v26  ;;  %1657 = vmatpush.msra.mxu1 %v2470_v25 }
 0x1f9   : > { %v1728_v24 = vsub.f32 %v1678_v19, %v1698_v20  ;;  %1699 = vmatpush.msra.mxu2 %v1698_v20 }
 0x1fa   : > { %1459 = vmatpush.msrb.mxu0 %v1458_v43  ;;  %1659 = vmatpush.msra.mxu1 %v2483_v47  ;;  %v1675_v47 = vld [vmem:[%s2558_s11] sm:$0xff] }
 0x1fb   : > { %v1729_v28 = vand.u32 4294901760, %v1728_v24 }
 0x1fc   : > { %1610 = vmatpush.msra.mxu0 %v1479_v21  ;;  %1661 = vmatpush.msra.mxu1 %v1452_v59  ;;  %v1677_v21 = vld [vmem:[%s2558_s11 + $0x10] sm:$0xff] }
 0x1fd   : > { %v1700_v25 = vand.u32 4294901760, %v1677_v21  ;;  %v1730_v52 = vsub.f32 %v1728_v24, %v1729_v28 }
 0x1fe   : > { %1614 = vmatpush.msra.mxu0 %v1485_v29  ;;  %1663 = vmatpush.msra.mxu1 %v1454_v6 }
 0x1ff   : > { %v1734_v29 = vsub.f32 %v1677_v21, %v1700_v25  ;;  %1701 = vmatpush.msra.mxu2 %v1700_v25  ;;  %v1731_v58 = vand.u32 4294901760, %v1730_v52 }
 0x200   : > { %1618 = vmatpush.msra.mxu0 %v1491_v57  ;;  %1665 = vmatpush.msra.mxu1 %v1456_v26  ;;  %v1704_v57 = vand.u32 4294901760, %v1675_v47 }
 0x201   : > { %v1735_v53 = vand.u32 4294901760, %v1734_v29  ;;  %1703 = vmatpush.msra.mxu2 %v1702_v30  ;;  %1732 = vmatpush.msra.mxu3 %v1731_v58 }
 0x202   : > { %1622 = vmatpush.msra.mxu0 %v1497_v2  ;;  %1667 = vmatpush.msra.mxu1 %v1458_v43  ;;  %v1746_v63 = vsub.f32 %v1675_v47, %v1704_v57  ;;  %v1742_v2 = vsub.f32 %v1740_v54, %v1741_v62 }
 0x203   : > { %v1736_v59 = vsub.f32 %v1734_v29, %v1735_v53  ;;  %1705 = vmatpush.msra.mxu2 %v1704_v57 }
 0x204   : > { %1626 = vmatpush.msra.mxu0 %v1503_v34  ;;  %v1747_v6 = vand.u32 4294901760, %v1746_v63  ;;  %v1743_v12 = vand.u32 4294901760, %v1742_v2 }
 0x205   : > { %v1737_v1 = vand.u32 4294901760, %v1736_v59 }
 0x206   : > { %1630 = vmatpush.msra.mxu0 %v1509_v41  ;;  %v1748_v13 = vsub.f32 %v1746_v63, %v1747_v6 }
 0x207   : > { %1738 = vmatpush.msra.mxu3 %v1737_v1 }
 0x208   : > { %1634 = vmatpush.msra.mxu0 %v1515_v46  ;;  %v1749_v14 = vand.u32 4294901760, %v1748_v13 }
 0x209   : > { %1744 = vmatpush.msra.mxu3 %v1743_v12 }
 0x20a   : > { %1638 = vmatpush.msra.mxu0 %v1521_v55 }
 0x20b   : > { %1750 = vmatpush.msra.mxu3 %v1749_v14 }
 0x260   : > { %v1302_v7 = vpop.f32.mrf.mxu1 }
 0x266   : > { %v1392_v4 = vpop.f32.mrf.mxu2 }
 0x267   : > { %v1417_v37 = vpop.f32.mrf.mxu3 }
 0x268   : > { %v1261_v8 = vpop.f32.mrf.mxu0  ;;  %v1359_v32 = vpop.f32.mrf.mxu1 }
 0x269   : > { %v1262_v15 = vadd.f32 %v1951_v0, %v1261_v8  ;;  %v1953_v0 = vld [vmem:[%s2559_s12] ss:$0 sm:$0xff] }
 0x26b   : > { %v1303_v22 = vadd.f32 %v1302_v7, %v1262_v15 }
 0x270   : > { %v1332_v39 = vpop.f32.mrf.mxu0 }
 0x271   : > { %v1333_v31 = vadd.f32 %v1332_v39, %v1303_v22 }
 0x273   : > { %v1360_v33 = vadd.f32 %v1359_v32, %v1333_v31 }
 0x275   : > { %v1393_v36 = vadd.f32 %v1392_v4, %v1360_v33 }
 0x277   : > { %v1418_v38 = vadd.f32 %v1417_v37, %v1393_v36 }
 0x279   : > { %v1420_v5 = vmax.f32 %v1418_v38, 0.0 }
 0x27b   : > { %v1434_v9 = vsel %vm981_vm1, %v1420_v5, 0 }
 0x27c   : > { %v1460_v10 = vand.u32 4294901760, %v1434_v9 }
 0x27e   : > { %1526 = vmatmul.f32.vlgmr.msrb.gmra.mxu1 %v1460_v10  ;;  %v1461_v11 = vsub.f32 %v1434_v9, %v1460_v10 }
 0x27f   : > { %1859 = vmatpush.msrb.mxu1 %v1698_v20 }
 0x280   : > { %1564 = vmatmul.f32.vlgmr.msrb.gmra.mxu2 %v1461_v11  ;;  %v1462_v16 = vand.u32 4294901760, %v1461_v11 }
 0x281   : > { %1861 = vmatpush.msrb.mxu1 %v1700_v25  ;;  %1770 = vmatpush.msrb.mxu2 %v1728_v24 }
 0x282   : > { %1595 = vmatmul.f32.vlgmr.msrb.gmra.mxu3 %v1462_v16  ;;  %v1463_v17 = vsub.f32 %v1461_v11, %v1462_v16 }
 0x283   : > { %1863 = vmatpush.msrb.mxu1 %v1702_v30  ;;  %1773 = vmatpush.msrb.mxu2 %v1734_v29 }
 0x284   : > { %v1464_v18 = vand.u32 4294901760, %v1463_v17  ;;  %1799 = vmatpush.msrb.mxu3 %v1698_v20 }
 0x285   : > { %1865 = vmatpush.msrb.mxu1 %v1704_v57  ;;  %1776 = vmatpush.msrb.mxu2 %v1740_v54 }
 0x286   : > { %1465 = vmatmul.f32.vlgmr.msrb.gmra.mxu0 %v1464_v18  ;;  %1669 = vmatmul.f32.vlgmr.msra.gmra.mxu1 %v1460_v10 }
 0x287   : > { %1828 = vmatpush.msrb.mxu0 %v1729_v28  ;;  %1779 = vmatpush.msrb.mxu2 %v1746_v63 }
 0x288   : > { %1801 = vmatpush.msrb.mxu3 %v1700_v25 }
 0x289   : > { %1832 = vmatpush.msrb.mxu0 %v1735_v53 }
 0x28a   : > { %1803 = vmatpush.msrb.mxu3 %v1702_v30 }
 0x28b   : > { %1836 = vmatpush.msrb.mxu0 %v1741_v62 }
 0x28c   : > { %1805 = vmatpush.msrb.mxu3 %v1704_v57 }
 0x28d   : > { %1840 = vmatpush.msrb.mxu0 %v1747_v6 }
 0x28e   : > { %1640 = vmatmul.f32.vlgmr.msra.gmra.mxu0 %v1460_v10 }
 0x2fb   : > { %v1527_v3 = vpop.f32.mrf.mxu1 }
 0x303   : > { %v1466_v26 = vpop.f32.mrf.mxu0  ;;  %v1565_v40 = vpop.f32.mrf.mxu2 }
 0x304   : > { %v1467_v34 = vadd.f32 %v1952_v23, %v1466_v26  ;;  %v1670_v46 = vpop.f32.mrf.mxu1 }
 0x305   : > { %v1596_v42 = vpop.f32.mrf.mxu3 }
 0x306   : > { %v1528_v35 = vadd.f32 %v1527_v3, %v1467_v34 }
 0x308   : > { %v1566_v41 = vadd.f32 %v1565_v40, %v1528_v35 }
 0x30a   : > { %v1597_v43 = vadd.f32 %v1596_v42, %v1566_v41 }
 0x30b   : > { %v1641_v44 = vpop.f32.mrf.mxu0 }
 0x30c   : > { %v1642_v45 = vadd.f32 %v1641_v44, %v1597_v43 }
 0x30e   : > { %v1671_v48 = vadd.f32 %v1670_v46, %v1642_v45 }
 0x310   : > { %v1673_v49 = vmax.f32 %v1671_v48, 0.0 }
 0x312   : > { %v1684_v50 = vsel %vm1231_vm2, %v1673_v49, 0  ;;  %1674 = vst.msk [vmem:[%s2535_s27] sm:$0xff] %vm1231_vm2, %v1673_v49 }
 0x313   : > { %v1706_v51 = vand.u32 4294901760, %v1684_v50 }
 0x315   : > { %v1707_v55 = vsub.f32 %v1684_v50, %v1706_v51  ;;  %1752 = vmatmul.f32.vlgmr.msra.gmra.mxu3 %v1706_v51  ;;  %1842 = vmatmul.f32.vlgmr.msrb.gmra.mxu0 %v1706_v51 }
 0x316   : > { %1867 = vmatmul.f32.vlgmr.msrb.gmra.mxu1 %v1706_v51 }
 0x317   : > { %v1708_v56 = vand.u32 4294901760, %v1707_v55 }
 0x319   : > { %v1709_v60 = vsub.f32 %v1707_v55, %v1708_v56 }
 0x31b   : > { %v1710_v61 = vand.u32 4294901760, %v1709_v60 }
 0x31d   : > { %1711 = vmatmul.f32.vlgmr.msra.gmra.mxu2 %v1710_v61  ;;  %1809 = vmatmul.f32.vlgmr.msrb.gmra.mxu3 %v1708_v56 }
 0x325   : > { %1782 = vmatmul.f32.vlgmr.msrb.gmra.mxu2 %v1707_v55 }
 0x392   : > { %v1843_v4 = vpop.f32.mrf.mxu0 }
 0x393   : > { %v1868_v37 = vpop.f32.mrf.mxu1 }
 0x398   : > { %v1753_v7 = vpop.f32.mrf.mxu3 }
 0x3a0   : > { %v1712_v8 = vpop.f32.mrf.mxu2  ;;  %v1810_v32 = vpop.f32.mrf.mxu3 }
 0x3a1   : > { %v1713_v15 = vadd.f32 %v1953_v0, %v1712_v8 }
 0x3a3   : > { %v1754_v22 = vadd.f32 %v1753_v7, %v1713_v15 }
 0x3a8   : > { %v1783_v39 = vpop.f32.mrf.mxu2 }
 0x3a9   : > { %v1784_v31 = vadd.f32 %v1783_v39, %v1754_v22 }
 0x3ab   : > { %v1811_v33 = vadd.f32 %v1810_v32, %v1784_v31 }
 0x3ad   : > { %v1844_v36 = vadd.f32 %v1843_v4, %v1811_v33 }
 0x3af   : > { %v1869_v38 = vadd.f32 %v1868_v37, %v1844_v36 }
 0x3b1   : > { %1872 = vrot.lane.b32.xlu0 %v1869_v38, %s1962_s29 }
 0x423   : > { %v1873_v5 = vpop.permute.xlu0 %1872 }
 0x424   : > { %1876 = vst.msk [vmem:[%s2535_s27] sm:$0xff] %vm1875_vm3, %v1873_v5 }
 0x425 PF: > { %s23_s25 = sadd.s32 1, %s1960_s25  }
 0x426   : > { %p20_p4 = scmp.ge.s32.totalorder %s23_s25, 4  }
 0x428   :  { %22 = sbr.rel (!%p20_p4) target bundleno = 1 (0x1), region = 102 }

</bundles_post_ra>
